<compile_context>
chip_gen: v5e
topology: v5e:2x2
jax: 0.10.0
libtpu: 0.0.40
codegen_flags: <defaults>
</compile_context>

<pallas_src>
import math
import functools

import jax
import jax.numpy as jnp
from jax.experimental import pallas as pl
from jax.experimental.pallas import tpu as pltpu


def _round_up(x: int, m: int) -> int:
    return ((x + m - 1) // m) * m


def _pick_tff(d_ff: int, target: int) -> int:
    """d_ff chunk size: full d_ff if small, else a 128-multiple divisor."""
    if d_ff <= target:
        return d_ff
    t = (target // 128) * 128
    while t >= 128:
        if d_ff % t == 0:
            return t
        t -= 128
    return d_ff  # no 128-multiple divisor: keep weights fully resident


def _ffn_kernel(x_ref, w1_ref, b1_ref, w2_ref, b2_ref, o_ref, acc_ref):
    # x_ref:   (tm, d_model)      input row tile (revisited across k)
    # w1_ref:  (d_model, tff)     fc1 weight chunk (stored transposed)
    # b1_ref:  (1, tff)           fc1 bias chunk
    # w2_ref:  (tff, d_model)     fc2 weight chunk (stored transposed)
    # b2_ref:  (1, d_model)       fc2 bias
    # o_ref:   (tm, d_model)      output row tile
    # acc_ref: (tm, d_model) f32  partial-sum accumulator over d_ff chunks
    k = pl.program_id(1)

    @pl.when(k == 0)
    def _():
        acc_ref[...] = jnp.zeros_like(acc_ref)

    x = x_ref[...]
    # fc1 chunk (+bias, ReLU): MXU matmul with f32 accumulation, ReLU on VPU.
    h = jnp.dot(x, w1_ref[...], preferred_element_type=jnp.float32) + b1_ref[...]
    h = jnp.maximum(h, 0.0)
    # fc2 partial product over this d_ff chunk, accumulated in f32.
    acc_ref[...] += jnp.dot(h.astype(w2_ref.dtype), w2_ref[...],
                            preferred_element_type=jnp.float32)

    @pl.when(k == pl.num_programs(1) - 1)
    def _():
        o_ref[...] = (acc_ref[...] + b2_ref[...]).astype(o_ref.dtype)


@functools.partial(jax.jit, static_argnames=("tm", "tff"))
def ffn_forward(x, w1_t, b1, w2_t, b2, *, tm=256, tff=2048):
    """x: (N, d_model); w1_t: (d_model, d_ff); w2_t: (d_ff, d_model)."""
    N, d_model = x.shape
    d_ff = w1_t.shape[1]

    # Row tile: multiple of 8 (sublane); shrink for tiny inputs to avoid
    # wasteful padding, pad N up to a tile multiple otherwise.
    tm_eff = max(8, (int(tm) // 8) * 8)
    tm_eff = min(tm_eff, _round_up(N, 8))
    n_pad = _round_up(N, tm_eff)

    tff_eff = _pick_tff(d_ff, int(tff))
    n_ff = d_ff // tff_eff

    x_in = x if n_pad == N else jnp.pad(x, ((0, n_pad - N), (0, 0)))

    isz_x = x.dtype.itemsize
    isz_w = w1_t.dtype.itemsize
    # VMEM footprint: double-buffered weight/bias chunks + x/out tiles + f32 acc.
    need = (2 * (d_model * tff_eff + tff_eff * d_model + tff_eff + d_model) * isz_w
            + 2 * 2 * tm_eff * d_model * isz_x
            + tm_eff * d_model * 4)
    vmem_limit = int(min(64 << 20, max(2 * need + (4 << 20), 32 << 20)))

    n_row_tiles = n_pad // tm_eff
    flops = 2 * 2 * n_pad * d_model * d_ff  # two matmuls
    bytes_accessed = (n_pad * d_model * isz_x * 2
                      + n_row_tiles * (2 * d_model * d_ff + d_ff + d_model) * isz_w)

    out = pl.pallas_call(
        _ffn_kernel,
        out_shape=jax.ShapeDtypeStruct((n_pad, d_model), x.dtype),
        grid_spec=pltpu.PrefetchScalarGridSpec(
            num_scalar_prefetch=0,
            grid=(n_row_tiles, n_ff),
            in_specs=[
                pl.BlockSpec((tm_eff, d_model), lambda i, k: (i, 0)),   # x rows
                pl.BlockSpec((d_model, tff_eff), lambda i, k: (0, k)),  # W1^T chunk
                pl.BlockSpec((1, tff_eff), lambda i, k: (0, k)),        # b1 chunk
                pl.BlockSpec((tff_eff, d_model), lambda i, k: (k, 0)),  # W2^T chunk
                pl.BlockSpec((1, d_model), lambda i, k: (0, 0)),        # b2
            ],
            out_specs=pl.BlockSpec((tm_eff, d_model), lambda i, k: (i, 0)),
            scratch_shapes=[pltpu.VMEM((tm_eff, d_model), jnp.float32)],
        ),
        compiler_params=pltpu.CompilerParams(
            dimension_semantics=("parallel", "arbitrary"),
            vmem_limit_bytes=vmem_limit,
        ),
        cost_estimate=pl.CostEstimate(
            flops=flops, transcendentals=0, bytes_accessed=bytes_accessed),
    )(x_in, w1_t, b1, w2_t, b2)

    return out if n_pad == N else out[:N]


def init_ffn_params(key, d_model, d_ff, dtype=jnp.float32):
    """Deterministic init matching torch.nn.Linear's U(-1/sqrt(fan_in), +)."""
    k1, k2, k3, k4 = jax.random.split(key, 4)
    bound1 = 1.0 / math.sqrt(d_model)
    bound2 = 1.0 / math.sqrt(d_ff)
    # Stored transposed: (in_features, out_features)
    w1_t = jax.random.uniform(k1, (d_model, d_ff), dtype, -bound1, bound1)
    b1 = jax.random.uniform(k2, (1, d_ff), dtype, -bound1, bound1)
    w2_t = jax.random.uniform(k3, (d_ff, d_model), dtype, -bound2, bound2)
    b2 = jax.random.uniform(k4, (1, d_model), dtype, -bound2, bound2)
    return w1_t, b1, w2_t, b2


if __name__ == "__main__":
    d_model, d_ff = 32, 64
    batch, seq = 2, 8

    key = jax.random.PRNGKey(0)
    kx, kp = jax.random.split(key)
    x3 = jax.random.normal(kx, (batch, seq, d_model), dtype=jnp.float32)
    w1_t, b1, w2_t, b2 = init_ffn_params(kp, d_model, d_ff, dtype=jnp.float32)

    # Reference in plain JAX (matches torch: fc2(relu(fc1(x)))).
    ref = jnp.maximum(x3 @ w1_t + b1[0], 0.0) @ w2_t + b2[0]

    # f32 path (tight tolerance).
    x2 = x3.reshape(batch * seq, d_model)
    out = ffn_forward(x2, w1_t, b1, w2_t, b2).reshape(batch, seq, d_model)
    jax.block_until_ready(out)
    assert jnp.allclose(out, ref, atol=1e-5, rtol=1e-5), "f32 mismatch vs reference"

    # bf16 weights/activations (recommended MXU feed on v6e/v7x), f32 accumulation.
    xb = x2.astype(jnp.bfloat16)
    w1b, b1b, w2b, b2b = (a.astype(jnp.bfloat16) for a in (w1_t, b1, w2_t, b2))
    outb = ffn_forward(xb, w1b, b1b, w2b, b2b).reshape(batch, seq, d_model)
    jax.block_until_ready(outb)
    assert jnp.allclose(outb.astype(jnp.float32), ref, atol=1e-1, rtol=1e-1), \
        "bf16 mismatch vs reference"

    print("KERNEL_OK")
</pallas_src>

<mosaic_0001>
module attributes {stable_mosaic.version = 11 : i64} {
  func.func @_ffn_kernel(%arg0: i32, %arg1: i32, %arg2: memref<16x32xf32, #tpu.memory_space<vmem>>, %arg3: memref<32x64xf32, #tpu.memory_space<vmem>>, %arg4: memref<1x64xf32, #tpu.memory_space<vmem>>, %arg5: memref<64x32xf32, #tpu.memory_space<vmem>>, %arg6: memref<1x32xf32, #tpu.memory_space<vmem>>, %arg7: memref<16x32xf32, #tpu.memory_space<vmem>>, %arg8: memref<16x32xf32, #tpu.memory_space<vmem>>) attributes {dimension_semantics = [#tpu.dimension_semantics<parallel>, #tpu.dimension_semantics<arbitrary>], iteration_bounds = array<i64: 1, 1>, scalar_prefetch = 0 : i64, scratch_operands = 1 : i64, tpu.core_type = #tpu.core_type<tc>, window_params = [{transform_indices = @transform_0, window_bounds = array<i64: 16, 32>}, {transform_indices = @transform_1, window_bounds = array<i64: 32, 64>}, {transform_indices = @transform_2, window_bounds = array<i64: 1, 64>}, {transform_indices = @transform_3, window_bounds = array<i64: 64, 32>}, {pipeline_mode = #tpu.pipeline_mode<synchronous>, transform_indices = @transform_4, window_bounds = array<i64: 1, 32>}, {transform_indices = @transform_5, window_bounds = array<i64: 16, 32>}]} {
    %c0_i32 = arith.constant 0 : i32
    %0 = arith.cmpi eq, %arg1, %c0_i32 : i32
    %1 = arith.extui %0 : i1 to i32
    %c0_i32_0 = arith.constant 0 : i32
    %2 = arith.cmpi ne, %1, %c0_i32_0 : i32
    scf.if %2 {
      %cst_16 = arith.constant 0.000000e+00 : f32
      %19 = vector.broadcast %cst_16 : f32 to vector<16x32xf32>
      %c0_17 = arith.constant 0 : index
      %c0_18 = arith.constant 0 : index
      %20 = vector.load %arg8[%c0_17, %c0_18] : memref<16x32xf32, #tpu.memory_space<vmem>>, vector<16x32xf32>
      tpu.vector_store %arg8[%c0_17, %c0_18], %19 {strides = array<i32>} : memref<16x32xf32, #tpu.memory_space<vmem>>, vector<16x32xf32>,
    } else {
    }
    %c0 = arith.constant 0 : index
    %c0_1 = arith.constant 0 : index
    %3 = vector.load %arg2[%c0, %c0_1] : memref<16x32xf32, #tpu.memory_space<vmem>>, vector<16x32xf32>
    %c0_2 = arith.constant 0 : index
    %c0_3 = arith.constant 0 : index
    %4 = vector.load %arg3[%c0_2, %c0_3] : memref<32x64xf32, #tpu.memory_space<vmem>>, vector<32x64xf32>
    %cst = arith.constant dense<0.000000e+00> : vector<16x64xf32>
    %5 = tpu.matmul %3, %4, %cst {dimension_numbers = #tpu.dot_dimension_numbers<[1], [0], [0], [1], [0, 0, 1, 1], [], []>} : vector<16x32xf32>, vector<32x64xf32>, vector<16x64xf32> -> vector<16x64xf32>
    %c0_4 = arith.constant 0 : index
    %c0_5 = arith.constant 0 : index
    %6 = vector.load %arg4[%c0_4, %c0_5] : memref<1x64xf32, #tpu.memory_space<vmem>>, vector<1x64xf32>
    %7 = vector.broadcast %6 : vector<1x64xf32> to vector<16x64xf32>
    %8 = arith.addf %5, %7 : vector<16x64xf32>
    %cst_6 = arith.constant 0.000000e+00 : f32
    %9 = vector.broadcast %cst_6 : f32 to vector<16x64xf32>
    %10 = arith.maximumf %8, %9 : vector<16x64xf32>
    %c0_7 = arith.constant 0 : index
    %c0_8 = arith.constant 0 : index
    %11 = vector.load %arg8[%c0_7, %c0_8] : memref<16x32xf32, #tpu.memory_space<vmem>>, vector<16x32xf32>
    %c0_9 = arith.constant 0 : index
    %c0_10 = arith.constant 0 : index
    %12 = vector.load %arg5[%c0_9, %c0_10] : memref<64x32xf32, #tpu.memory_space<vmem>>, vector<64x32xf32>
    %cst_11 = arith.constant dense<0.000000e+00> : vector<16x32xf32>
    %13 = tpu.matmul %10, %12, %cst_11 {dimension_numbers = #tpu.dot_dimension_numbers<[1], [0], [0], [1], [0, 0, 1, 1], [], []>} : vector<16x64xf32>, vector<64x32xf32>, vector<16x32xf32> -> vector<16x32xf32>
    %14 = arith.addf %11, %13 : vector<16x32xf32>
    %c0_12 = arith.constant 0 : index
    %c0_13 = arith.constant 0 : index
    %15 = vector.load %arg8[%c0_12, %c0_13] : memref<16x32xf32, #tpu.memory_space<vmem>>, vector<16x32xf32>
    tpu.vector_store %arg8[%c0_12, %c0_13], %14 {strides = array<i32>} : memref<16x32xf32, #tpu.memory_space<vmem>>, vector<16x32xf32>,
    %c0_i32_14 = arith.constant 0 : i32
    %16 = arith.cmpi eq, %arg1, %c0_i32_14 : i32
    %17 = arith.extui %16 : i1 to i32
    %c0_i32_15 = arith.constant 0 : i32
    %18 = arith.cmpi ne, %17, %c0_i32_15 : i32
    scf.if %18 {
      %c0_16 = arith.constant 0 : index
      %c0_17 = arith.constant 0 : index
      %19 = vector.load %arg8[%c0_16, %c0_17] : memref<16x32xf32, #tpu.memory_space<vmem>>, vector<16x32xf32>
      %c0_18 = arith.constant 0 : index
      %c0_19 = arith.constant 0 : index
      %20 = vector.load %arg6[%c0_18, %c0_19] : memref<1x32xf32, #tpu.memory_space<vmem>>, vector<1x32xf32>
      %21 = vector.broadcast %20 : vector<1x32xf32> to vector<16x32xf32>
      %22 = arith.addf %19, %21 : vector<16x32xf32>
      %c0_20 = arith.constant 0 : index
      %c0_21 = arith.constant 0 : index
      %23 = vector.load %arg7[%c0_20, %c0_21] : memref<16x32xf32, #tpu.memory_space<vmem>>, vector<16x32xf32>
      tpu.vector_store %arg7[%c0_20, %c0_21], %22 {strides = array<i32>} : memref<16x32xf32, #tpu.memory_space<vmem>>, vector<16x32xf32>,
    } else {
    }
    return
  }
  func.func @transform_0(%arg0: i32, %arg1: i32) -> (i32, i32) {
    %c0_i32 = arith.constant 0 : i32
    %c0_i32_0 = arith.constant 0 : i32
    return %arg0, %c0_i32 : i32, i32
  }
  func.func @transform_1(%arg0: i32, %arg1: i32) -> (i32, i32) {
    %c0_i32 = arith.constant 0 : i32
    %c0_i32_0 = arith.constant 0 : i32
    return %c0_i32, %arg1 : i32, i32
  }
  func.func @transform_2(%arg0: i32, %arg1: i32) -> (i32, i32) {
    %c0_i32 = arith.constant 0 : i32
    %c0_i32_0 = arith.constant 0 : i32
    return %c0_i32, %arg1 : i32, i32
  }
  func.func @transform_3(%arg0: i32, %arg1: i32) -> (i32, i32) {
    %c0_i32 = arith.constant 0 : i32
    %c0_i32_0 = arith.constant 0 : i32
    return %arg1, %c0_i32 : i32, i32
  }
  func.func @transform_4(%arg0: i32, %arg1: i32) -> (i32, i32) {
    %c0_i32 = arith.constant 0 : i32
    %c0_i32_0 = arith.constant 0 : i32
    %c0_i32_1 = arith.constant 0 : i32
    return %c0_i32, %c0_i32_0 : i32, i32
  }
  func.func @transform_5(%arg0: i32, %arg1: i32) -> (i32, i32) {
    %c0_i32 = arith.constant 0 : i32
    %c0_i32_0 = arith.constant 0 : i32
    return %arg0, %c0_i32 : i32, i32
  }
}

</mosaic_0001>

<bundles_post_ra>
// kernel: ffn_forward.1
= control target key start
LH: loop header
LB: loop body
LE: loop exit
PB: predicated region body
PF: predicated region fallthrough
CT: control target
= control target key end

     0   :  { %s286_s0 = inlined_call_operand.vmem [shape: f32[16,32], index: 0, kind: input, shape index: {}]   ;;  %s287_s1 = inlined_call_operand.vmem [shape: f32[32,64], index: 1, kind: input, shape index: {}]   ;;  %s288_s2 = inlined_call_operand.vmem [shape: f32[1,64], index: 2, kind: input, shape index: {}]   ;;  %s289_s3 = inlined_call_operand.vmem [shape: f32[64,32], index: 3, kind: input, shape index: {}]   ;;  %s290_s4 = inlined_call_operand.vmem [shape: f32[1,32], index: 4, kind: input, shape index: {}]   ;;  %s291_s5 = inlined_call_operand.hbm [shape: f32[16,32], index: 5, kind: output, shape index: {}]  }
   0x1   :  { %v33_v0 = vld [vmem:[%s287_s1 + $0x18] sm:$0xff]  ;;  %v32_v1 = vld [vmem:[%s287_s1 + $0x10] sm:$0xff]  ;;  %v31_v2 = vld [vmem:[%s287_s1 + $0x8] sm:$0xff] }
   0x2   :  { %149 = vmatpush.msra.mxu3 %v33_v0  ;;  %57 = vmatpush.msra.mxu0 %v33_v0  ;;  %v79_v3 = vld [vmem:[%s289_s3 + $0x38] sm:$0xff]  ;;  %v78_v4 = vld [vmem:[%s289_s3 + $0x30] sm:$0xff]  ;;  %v30_v5 = vld [vmem:[%s287_s1] sm:$0xff] }
   0x3   :  { %153 = vmatpush.msra.mxu2 %v79_v3  ;;  %95 = vmatpush.msra.mxu1 %v79_v3 }
   0x4   :  { %150 = vmatpush.msra.mxu3 %v32_v1  ;;  %58 = vmatpush.msra.mxu0 %v32_v1 }
   0x5   :  { %10 = vsyncpa [#allocation4], 0  ;;  %vm25_vm0 = vcmask 261120   ;;  %v29_v6 = vld [vmem:[%s286_s0 + $0x8] sm:$0xff]  ;;  %v28_v7 = vld [vmem:[%s286_s0] sm:$0xff]  ;;  %154 = vmatpush.msra.mxu2 %v78_v4  ;;  %96 = vmatpush.msra.mxu1 %v78_v4  ;;  %v193_v14 = vmov 0.0  }
   0x6   :  { %151 = vmatpush.msra.mxu3 %v31_v2  ;;  %59 = vmatpush.msra.mxu0 %v31_v2  ;;  %v77_v8 = vld [vmem:[%s289_s3 + $0x28] sm:$0xff]  ;;  %v76_v9 = vld [vmem:[%s289_s3 + $0x20] sm:$0xff]  ;;  %v75_v10 = vld [vmem:[%s289_s3 + $0x18] sm:$0xff]  ;;  %26 = vst.msk [vmem:[#allocation2] sm:$0xff] %vm25_vm0, %v193_v14  ;;  %vm80_vm1 = vcmask 523264   ;;  %s133_s25 = sshll.u32 %s291_s5, 4  ;;  %s134_s25 = int_to_ptr.hbm [resolvable:$true] %s133_s25 }
   0x7   :  { %155 = vmatpush.msra.mxu2 %v77_v8  ;;  %97 = vmatpush.msra.mxu1 %v77_v8  ;;  %v74_v11 = vld [vmem:[%s289_s3 + $0x10] sm:$0xff]  ;;  %v73_v12 = vld [vmem:[%s289_s3 + $0x8] sm:$0xff]  ;;  %v72_v13 = vld [vmem:[%s289_s3] sm:$0xff]  ;;  %27 = vst.msk [vmem:[#allocation2 + $0x8] sm:$0xff] %vm25_vm0, %v193_v14  ;;  %s196_s26 = smov 8  }
   0x8   :  { %152 = vmatpush.msra.mxu3 %v30_v5  ;;  %60 = vmatpush.msra.mxu0 %v30_v5  ;;  %v165_v15 = vld [vmem:[%s288_s2] ss:$0 sm:$0xff]  ;;  %s194_s2 = smov [#allocation3]  }
   0x9   :  { %146 = vmatmul.msk.f32.vlgmr.msra.gmra.mxu3 %vm25_vm0, %v29_v6  ;;  %145 = vmatmul.msk.f32.vlgmr.msra.gmra.mxu0 %vm25_vm0, %v28_v7  ;;  %v166_v25 = vld [vmem:[%s290_s4] ss:$0 sm:$0xff]  ;;  %s131_s22 = sshll.u32 %s194_s2, 4  ;;  %s195_s4 = smov 128   ;;  %s132_s22 = int_to_ptr.vmem [resolvable:$true] %s131_s22 }
   0xa   :  { %156 = vmatpush.msra.mxu2 %v76_v9  ;;  %98 = vmatpush.msra.mxu1 %v76_v9 }
   0xc   :  { %157 = vmatpush.msra.mxu2 %v75_v10  ;;  %99 = vmatpush.msra.mxu1 %v75_v10 }
   0xd   :  { %v70_v22 = vld [vmem:[#allocation2] sm:$0xff] }
   0xe   :  { %158 = vmatpush.msra.mxu2 %v74_v11  ;;  %100 = vmatpush.msra.mxu1 %v74_v11  ;;  %v71_v26 = vld [vmem:[#allocation2 + $0x8] sm:$0xff] }
  0x10   :  { %159 = vmatpush.msra.mxu2 %v73_v12  ;;  %101 = vmatpush.msra.mxu1 %v73_v12 }
  0x12   :  { %160 = vmatpush.msra.mxu2 %v72_v13  ;;  %102 = vmatpush.msra.mxu1 %v72_v13 }
  0x86   :  { %v62_v16 = vpop.f32.mrf.mxu0 }
  0x87   :  { %v63_v17 = vadd.f32 %v165_v15, %v62_v16 }
  0x89   :  { %v68_v18 = vmax.f32 %v63_v17, 0.0 }
  0x8b   :  { %147 = vmatmul.msk.f32.vlgmr.msra.gmra.mxu1 %vm80_vm1, %v68_v18 }
  0x8c   :  { %v65_v19 = vpop.f32.mrf.mxu3 }
  0x8d   :  { %v66_v20 = vadd.f32 %v165_v15, %v65_v19 }
  0x8f   :  { %v69_v21 = vmax.f32 %v66_v20, 0.0 }
  0x91   :  { %148 = vmatmul.msk.f32.vlgmr.msra.gmra.mxu2 %vm80_vm1, %v69_v21 }
 0x108   :  { %v104_v23 = vpop.f32.mrf.mxu1 }
 0x109   :  { %v110_v24 = vadd.f32 %v104_v23, %v70_v22 }
 0x10b   :  { %112 = vst.msk [vmem:[#allocation2] sm:$0xff] %vm25_vm0, %v110_v24 }
 0x112   :  { %v117_v27 = vld [vmem:[#allocation2] sm:$0xff] }
 0x113   :  { %v123_v28 = vadd.f32 %v166_v25, %v117_v27 }
 0x114   :  { %v107_v29 = vpop.f32.mrf.mxu2 }
 0x115   :  { %v111_v30 = vadd.f32 %v107_v29, %v71_v26  ;;  %125 = vst.msk [vmem:[#allocation3] sm:$0xff] %vm25_vm0, %v123_v28 }
 0x117   :  { %113 = vst.msk [vmem:[#allocation2 + $0x8] sm:$0xff] %vm25_vm0, %v111_v30 }
 0x11e   :  { %v118_v31 = vld [vmem:[#allocation2 + $0x8] sm:$0xff] }
 0x11f   :  { %v124_v32 = vadd.f32 %v166_v25, %v118_v31 }
 0x121   :  { %126 = vst.msk [vmem:[#allocation3 + $0x8] sm:$0xff] %vm25_vm0, %v124_v32 }
 0x122   :  { %139 = dma.vmem_to_hbm [thread:$0]  %s132_s22, 256, %s134_s25, [#allocation4], %s195_s4, %s195_s4, %s196_s26  }
 0x123   :  { %191 = dma.done.wait [#allocation4], 256  }
 0x124   :  { %192 = vsyncadd [#allocation4], 4294967040 }
 0x125   :  { %144 = vsyncpa [#allocation4], 1 }

</bundles_post_ra>
